<compile_context>
chip_gen: v6e
topology: v6e:2x2x1
jax: 0.10.0
libtpu: 0.0.40
codegen_flags: <defaults>
</compile_context>

<pallas_src>
import functools

import jax
import jax.numpy as jnp
from jax.experimental import pallas as pl
from jax.experimental.pallas import tpu as pltpu


def _round_up(x, m):
    return ((x + m - 1) // m) * m


# ----------------------------------------------------------------------------
# Kernel
# ----------------------------------------------------------------------------
def _fused_mlp_kernel(x_ref, wa_ref, wb_ref, b_ref, out_ref, *,
                      in_rows, hidden_pad, out_pad, action_dim):
    H = hidden_pad
    wdt = wa_ref.dtype

    # --- static, tile-aligned slices into the packed weight / bias slabs ---
    r = 0
    w1 = wa_ref[r:r + in_rows, 0:H]; r += in_rows        # [in_rows, H]
    w2 = wa_ref[r:r + H, 0:H]; r += H                    # [H, H]
    wh2 = wa_ref[r:r + 3 * H, 0:out_pad]                 # block-diag head layer 2
    wh1 = wb_ref[...]                                    # fused head layer 1 [H, 3H]

    b1 = b_ref[:, 0:H]
    b2 = b_ref[:, H:2 * H]
    bh1 = b_ref[:, 2 * H:5 * H]
    bh2 = b_ref[:, 5 * H:5 * H + out_pad]

    x = x_ref[...].astype(wdt)

    # --- feature extractor: Linear -> ReLU -> Linear -> ReLU (f32 accum) ----
    h1 = jnp.dot(x, w1, preferred_element_type=jnp.float32) + b1
    h1 = jnp.maximum(h1, 0.0).astype(wdt)
    feat = jnp.dot(h1, w2, preferred_element_type=jnp.float32) + b2
    feat = jnp.maximum(feat, 0.0).astype(wdt)

    # --- all three heads fused into two matmuls -----------------------------
    heads = jnp.dot(feat, wh1, preferred_element_type=jnp.float32) + bh1
    heads = jnp.maximum(heads, 0.0).astype(wdt)
    z = jnp.dot(heads, wh2, preferred_element_type=jnp.float32) + bh2   # [tb, out_pad]
    # z columns: [0, action_dim) actor logits, action_dim value,
    #            action_dim+1 coverage logit, rest zero padding.

    lane = jax.lax.broadcasted_iota(jnp.int32, z.shape, 1)
    is_logit = lane < action_dim
    is_value = lane == action_dim
    is_cov = lane == action_dim + 1

    # One fused exp pass: softmax numerator on the logit lanes, exp(-z)
    # (clamped, no overflow) on the coverage lane, underflow-to-zero elsewhere.
    m = jnp.max(jnp.where(is_logit, z, -1e30), axis=-1, keepdims=True)
    exp_arg = jnp.where(is_logit, z - m,
                        jnp.where(is_cov, jnp.clip(-z, -30.0, 30.0), -1e4))
    e = jnp.exp(exp_arg)
    e_logit = jnp.where(is_logit, e, 0.0)
    denom = jnp.sum(e_logit, axis=-1, keepdims=True)

    probs = e_logit / denom            # exact divide -> probs sum to 1
    sig = 1.0 / (1.0 + e)              # exact; only the coverage lane is kept

    out = jnp.where(is_logit, probs,
                    jnp.where(is_value, z,
                              jnp.where(is_cov, sig, 0.0)))
    out_ref[...] = out.astype(out_ref.dtype)


# ----------------------------------------------------------------------------
# Wrapper
# ----------------------------------------------------------------------------
@functools.partial(
    jax.jit,
    static_argnames=("input_dim", "hidden_dim", "action_dim", "block_b"))
def multi_objective_forward(state, w_a, w_b, b_slab, *,
                            input_dim, hidden_dim, action_dim, block_b=1024):
    """Forward pass: returns (action_probs, value, coverage_pred)."""
    B = state.shape[0]
    in_rows = _round_up(input_dim, 8)          # sublane pad only (no 128-lane pad)
    H = _round_up(hidden_dim, 128)
    out_pad = _round_up(action_dim + 2, 128)

    if in_rows != input_dim:                   # tiny (<8 col) pad only if needed
        state = jnp.pad(state, ((0, 0), (0, in_rows - input_dim)))

    # Batch tile: multiple of 8 sublanes; no explicit batch padding (cdiv grid,
    # trailing partial block is row-wise independent and masked on writeback).
    tb = _round_up(min(block_b, B), 8)
    grid = (pl.cdiv(B, tb),)

    kernel = functools.partial(
        _fused_mlp_kernel,
        in_rows=in_rows, hidden_pad=H, out_pad=out_pad, action_dim=action_dim)

    flops = 2 * B * (in_rows * H + H * H + 3 * H * H + 3 * H * out_pad)
    bytes_accessed = (w_a.size * w_a.dtype.itemsize
                      + w_b.size * w_b.dtype.itemsize
                      + b_slab.size * b_slab.dtype.itemsize
                      + state.size * state.dtype.itemsize
                      + B * out_pad * 4)
    transcendentals = B * out_pad

    out = pl.pallas_call(
        kernel,
        out_shape=jax.ShapeDtypeStruct((B, out_pad), jnp.float32),
        grid=grid,
        in_specs=[
            pl.BlockSpec((tb, in_rows), lambda i: (i, 0)),   # x rows
            pl.BlockSpec(w_a.shape, lambda i: (0, 0)),       # resident weights (slab A)
            pl.BlockSpec(w_b.shape, lambda i: (0, 0)),       # resident weights (slab B)
            pl.BlockSpec(b_slab.shape, lambda i: (0, 0)),    # resident biases
        ],
        out_specs=pl.BlockSpec((tb, out_pad), lambda i: (i, 0)),
        compiler_params=pltpu.CompilerParams(
            dimension_semantics=("parallel",),
            vmem_limit_bytes=64 * 1024 * 1024),
        cost_estimate=pl.CostEstimate(
            flops=flops,
            transcendentals=transcendentals,
            bytes_accessed=bytes_accessed),
    )(state, w_a, w_b, b_slab)

    probs = out[:, :action_dim]
    value = out[:, action_dim:action_dim + 1]
    cov = out[:, action_dim + 1:action_dim + 2]
    return probs, value, cov


# ----------------------------------------------------------------------------
# Parameter construction / packing (host side, outside the kernel)
# ----------------------------------------------------------------------------
def init_params(key, input_dim, hidden_dim, action_dim):
    """PyTorch-like uniform fan-in init. Weights stored [in, out], biases [1, out]."""
    def linear(key, fan_in, fan_out):
        kw, kb = jax.random.split(key)
        bound = 1.0 / jnp.sqrt(fan_in)
        w = jax.random.uniform(kw, (fan_in, fan_out), jnp.float32, -bound, bound)
        b = jax.random.uniform(kb, (1, fan_out), jnp.float32, -bound, bound)
        return w, b

    keys = jax.random.split(key, 8)
    p = {}
    p["w1"], p["b1"] = linear(keys[0], input_dim, hidden_dim)
    p["w2"], p["b2"] = linear(keys[1], hidden_dim, hidden_dim)
    p["wa1"], p["ba1"] = linear(keys[2], hidden_dim, hidden_dim)
    p["wa2"], p["ba2"] = linear(keys[3], hidden_dim, action_dim)
    p["wv1"], p["bv1"] = linear(keys[4], hidden_dim, hidden_dim)
    p["wv2"], p["bv2"] = linear(keys[5], hidden_dim, 1)
    p["wc1"], p["bc1"] = linear(keys[6], hidden_dim, hidden_dim)
    p["wc2"], p["bc2"] = linear(keys[7], hidden_dim, 1)
    return p


def pack_params(p, input_dim, hidden_dim, action_dim, dtype=jnp.float32):
    """Pack all 16 arrays into two weight slabs + one bias slab (no dead columns).

    Slab A (narrow):  [w1 ; w2 ; block-diagonal head layer 2]   rows = in_rows+4H
    Slab B:           fused head layer 1  [H, 3H]  (actor | value | coverage)
    Biases:           (1, 5H + out_pad) f32.
    Use dtype=jnp.bfloat16 on v5e/v6e/v7x to halve weight DMA/VMEM."""
    in_rows = _round_up(input_dim, 8)
    H = _round_up(hidden_dim, 128)
    out_pad = _round_up(action_dim + 2, 128)
    a_cols = max(H, out_pad)

    def pad2(w, rows, cols):
        return jnp.zeros((rows, cols), jnp.float32).at[:w.shape[0], :w.shape[1]].set(w)

    wh2 = jnp.zeros((3 * H, a_cols), jnp.float32)
    wh2 = wh2.at[0:hidden_dim, 0:action_dim].set(p["wa2"])
    wh2 = wh2.at[H:H + hidden_dim, action_dim:action_dim + 1].set(p["wv2"])
    wh2 = wh2.at[2 * H:2 * H + hidden_dim, action_dim + 1:action_dim + 2].set(p["wc2"])
    w_a = jnp.concatenate([pad2(p["w1"], in_rows, a_cols),
                           pad2(p["w2"], H, a_cols),
                           wh2], axis=0)                       # (in_rows+4H, a_cols)

    w_b = jnp.concatenate([pad2(p["wa1"], H, H),
                           pad2(p["wv1"], H, H),
                           pad2(p["wc1"], H, H)], axis=1)      # (H, 3H)

    def padb(b, cols):
        b = b.reshape(1, -1)
        return jnp.zeros((1, cols), jnp.float32).at[:, :b.shape[1]].set(b)

    bh2 = jnp.zeros((1, out_pad), jnp.float32)
    bh2 = bh2.at[:, 0:action_dim].set(p["ba2"].reshape(1, -1))
    bh2 = bh2.at[:, action_dim:action_dim + 1].set(p["bv2"].reshape(1, -1))
    bh2 = bh2.at[:, action_dim + 1:action_dim + 2].set(p["bc2"].reshape(1, -1))
    b_slab = jnp.concatenate(
        [padb(p["b1"], H), padb(p["b2"], H),
         padb(p["ba1"], H), padb(p["bv1"], H), padb(p["bc1"], H), bh2], axis=1)

    return w_a.astype(dtype), w_b.astype(dtype), b_slab    # biases stay f32


def _reference_forward(state, p):
    """Plain-JAX reference matching the PyTorch module."""
    relu = lambda x: jnp.maximum(x, 0.0)
    feat = relu(relu(state @ p["w1"] + p["b1"]) @ p["w2"] + p["b2"])
    logits = relu(feat @ p["wa1"] + p["ba1"]) @ p["wa2"] + p["ba2"]
    probs = jax.nn.softmax(logits, axis=-1)
    value = relu(feat @ p["wv1"] + p["bv1"]) @ p["wv2"] + p["bv2"]
    cov = jax.nn.sigmoid(relu(feat @ p["wc1"] + p["bc1"]) @ p["wc2"] + p["bc2"])
    return probs, value, cov


if __name__ == "__main__":
    key = jax.random.PRNGKey(0)
    k_params, k_state1, k_state2 = jax.random.split(key, 3)

    batch = 8
    input_dim = 16
    hidden_dim = 32
    action_dim = 8

    params = init_params(k_params, input_dim, hidden_dim, action_dim)
    w_a, w_b, b_slab = pack_params(params, input_dim, hidden_dim, action_dim)

    # ---- small test (single grid step) ----
    state = jax.random.normal(k_state1, (batch, input_dim), jnp.float32)
    probs, value, cov = multi_objective_forward(
        state, w_a, w_b, b_slab,
        input_dim=input_dim, hidden_dim=hidden_dim, action_dim=action_dim)
    jax.block_until_ready((probs, value, cov))

    r_probs, r_value, r_cov = _reference_forward(state, params)
    assert probs.shape == (batch, action_dim)
    assert value.shape == (batch, 1)
    assert cov.shape == (batch, 1)
    assert jnp.allclose(probs, r_probs, atol=1e-3)
    assert jnp.allclose(value, r_value, atol=1e-3)
    assert jnp.allclose(cov, r_cov, atol=1e-3)
    assert jnp.allclose(jnp.sum(probs, axis=-1), 1.0, atol=1e-3)

    # ---- larger batch exercising the multi-step row grid + partial block ----
    batch2 = 300
    state2 = jax.random.normal(k_state2, (batch2, input_dim), jnp.float32)
    probs2, value2, cov2 = multi_objective_forward(
        state2, w_a, w_b, b_slab,
        input_dim=input_dim, hidden_dim=hidden_dim, action_dim=action_dim,
        block_b=128)
    jax.block_until_ready((probs2, value2, cov2))

    r_probs2, r_value2, r_cov2 = _reference_forward(state2, params)
    assert probs2.shape == (batch2, action_dim)
    assert value2.shape == (batch2, 1)
    assert cov2.shape == (batch2, 1)
    assert jnp.allclose(probs2, r_probs2, atol=1e-3)
    assert jnp.allclose(value2, r_value2, atol=1e-3)
    assert jnp.allclose(cov2, r_cov2, atol=1e-3)
    assert jnp.allclose(jnp.sum(probs2, axis=-1), 1.0, atol=1e-3)

    print("KERNEL_OK")
</pallas_src>

<mosaic_0001>
module attributes {stable_mosaic.version = 11 : i64} {
  func.func @_fused_mlp_kernel(%arg0: i32, %arg1: memref<8x16xf32, #tpu.memory_space<vmem>>, %arg2: memref<528x128xf32, #tpu.memory_space<vmem>>, %arg3: memref<128x384xf32, #tpu.memory_space<vmem>>, %arg4: memref<1x768xf32, #tpu.memory_space<vmem>>, %arg5: memref<8x128xf32, #tpu.memory_space<vmem>>) attributes {dimension_semantics = [#tpu.dimension_semantics<parallel>], iteration_bounds = array<i64: 1>, scalar_prefetch = 0 : i64, scratch_operands = 0 : i64, tpu.core_type = #tpu.core_type<tc>, window_params = [{transform_indices = @transform_0, window_bounds = array<i64: 8, 16>}, {pipeline_mode = #tpu.pipeline_mode<synchronous>, transform_indices = @transform_1, window_bounds = array<i64: 528, 128>}, {pipeline_mode = #tpu.pipeline_mode<synchronous>, transform_indices = @transform_2, window_bounds = array<i64: 128, 384>}, {pipeline_mode = #tpu.pipeline_mode<synchronous>, transform_indices = @transform_3, window_bounds = array<i64: 1, 768>}, {transform_indices = @transform_4, window_bounds = array<i64: 8, 128>}]} {
    %c0 = arith.constant 0 : index
    %c0_0 = arith.constant 0 : index
    %0 = vector.load %arg2[%c0, %c0_0] : memref<528x128xf32, #tpu.memory_space<vmem>>, vector<16x128xf32>
    %c16 = arith.constant 16 : index
    %c0_1 = arith.constant 0 : index
    %1 = vector.load %arg2[%c16, %c0_1] : memref<528x128xf32, #tpu.memory_space<vmem>>, vector<128x128xf32>
    %c144 = arith.constant 144 : index
    %c0_2 = arith.constant 0 : index
    %2 = vector.load %arg2[%c144, %c0_2] : memref<528x128xf32, #tpu.memory_space<vmem>>, vector<384x128xf32>
    %c0_3 = arith.constant 0 : index
    %c0_4 = arith.constant 0 : index
    %3 = vector.load %arg3[%c0_3, %c0_4] : memref<128x384xf32, #tpu.memory_space<vmem>>, vector<128x384xf32>
    %c0_5 = arith.constant 0 : index
    %c0_6 = arith.constant 0 : index
    %4 = vector.load %arg4[%c0_5, %c0_6] : memref<1x768xf32, #tpu.memory_space<vmem>>, vector<1x128xf32>
    %c0_7 = arith.constant 0 : index
    %c128 = arith.constant 128 : index
    %5 = vector.load %arg4[%c0_7, %c128] : memref<1x768xf32, #tpu.memory_space<vmem>>, vector<1x128xf32>
    %c0_8 = arith.constant 0 : index
    %c256 = arith.constant 256 : index
    %6 = vector.load %arg4[%c0_8, %c256] : memref<1x768xf32, #tpu.memory_space<vmem>>, vector<1x384xf32>
    %c0_9 = arith.constant 0 : index
    %c640 = arith.constant 640 : index
    %7 = vector.load %arg4[%c0_9, %c640] : memref<1x768xf32, #tpu.memory_space<vmem>>, vector<1x128xf32>
    %c0_10 = arith.constant 0 : index
    %c0_11 = arith.constant 0 : index
    %8 = vector.load %arg1[%c0_10, %c0_11] : memref<8x16xf32, #tpu.memory_space<vmem>>, vector<8x16xf32>
    %cst = arith.constant dense<0.000000e+00> : vector<8x128xf32>
    %9 = tpu.matmul %8, %0, %cst {dimension_numbers = #tpu.dot_dimension_numbers<[1], [0], [0], [1], [0, 0, 1, 1], [], []>} : vector<8x16xf32>, vector<16x128xf32>, vector<8x128xf32> -> vector<8x128xf32>
    %10 = vector.broadcast %4 : vector<1x128xf32> to vector<8x128xf32>
    %11 = arith.addf %9, %10 : vector<8x128xf32>
    %cst_12 = arith.constant 0.000000e+00 : f32
    %12 = vector.broadcast %cst_12 : f32 to vector<8x128xf32>
    %13 = arith.maximumf %11, %12 : vector<8x128xf32>
    %cst_13 = arith.constant dense<0.000000e+00> : vector<8x128xf32>
    %14 = tpu.matmul %13, %1, %cst_13 {dimension_numbers = #tpu.dot_dimension_numbers<[1], [0], [0], [1], [0, 0, 1, 1], [], []>} : vector<8x128xf32>, vector<128x128xf32>, vector<8x128xf32> -> vector<8x128xf32>
    %15 = vector.broadcast %5 : vector<1x128xf32> to vector<8x128xf32>
    %16 = arith.addf %14, %15 : vector<8x128xf32>
    %cst_14 = arith.constant 0.000000e+00 : f32
    %17 = vector.broadcast %cst_14 : f32 to vector<8x128xf32>
    %18 = arith.maximumf %16, %17 : vector<8x128xf32>
    %cst_15 = arith.constant dense<0.000000e+00> : vector<8x384xf32>
    %19 = tpu.matmul %18, %3, %cst_15 {dimension_numbers = #tpu.dot_dimension_numbers<[1], [0], [0], [1], [0, 0, 1, 1], [], []>} : vector<8x128xf32>, vector<128x384xf32>, vector<8x384xf32> -> vector<8x384xf32>
    %20 = vector.broadcast %6 : vector<1x384xf32> to vector<8x384xf32>
    %21 = arith.addf %19, %20 : vector<8x384xf32>
    %cst_16 = arith.constant 0.000000e+00 : f32
    %22 = vector.broadcast %cst_16 : f32 to vector<8x384xf32>
    %23 = arith.maximumf %21, %22 : vector<8x384xf32>
    %cst_17 = arith.constant dense<0.000000e+00> : vector<8x128xf32>
    %24 = tpu.matmul %23, %2, %cst_17 {dimension_numbers = #tpu.dot_dimension_numbers<[1], [0], [0], [1], [0, 0, 1, 1], [], []>} : vector<8x384xf32>, vector<384x128xf32>, vector<8x128xf32> -> vector<8x128xf32>
    %25 = vector.broadcast %7 : vector<1x128xf32> to vector<8x128xf32>
    %26 = arith.addf %24, %25 : vector<8x128xf32>
    %27 = tpu.iota {dimensions = array<i32: 1>} : vector<8x128xi32>
    %c8_i32 = arith.constant 8 : i32
    %28 = vector.broadcast %c8_i32 : i32 to vector<8x128xi32>
    %29 = arith.cmpi slt, %27, %28 : vector<8x128xi32>
    %c8_i32_18 = arith.constant 8 : i32
    %30 = vector.broadcast %c8_i32_18 : i32 to vector<8x128xi32>
    %31 = arith.cmpi eq, %27, %30 : vector<8x128xi32>
    %c9_i32 = arith.constant 9 : i32
    %32 = vector.broadcast %c9_i32 : i32 to vector<8x128xi32>
    %33 = arith.cmpi eq, %27, %32 : vector<8x128xi32>
    %cst_19 = arith.constant -1.000000e+30 : f32
    %34 = vector.broadcast %cst_19 : f32 to vector<8x128xf32>
    %35 = arith.select %29, %26, %34 : vector<8x128xi1>, vector<8x128xf32>
    %cst_20 = arith.constant dense<0xFF800000> : vector<8xf32>
    %36 = vector.multi_reduction <maximumf>, %35, %cst_20 [1] : vector<8x128xf32> to vector<8xf32>
    %37 = vector.shape_cast %36 : vector<8xf32> to vector<8x1xf32>
    %38 = vector.broadcast %37 : vector<8x1xf32> to vector<8x128xf32>
    %39 = arith.subf %26, %38 : vector<8x128xf32>
    %cst_21 = arith.constant 0.000000e+00 : f32
    %40 = vector.broadcast %cst_21 : f32 to vector<8x128xf32>
    %41 = arith.subf %40, %26 : vector<8x128xf32>
    %cst_22 = arith.constant -3.000000e+01 : f32
    %cst_23 = arith.constant 3.000000e+01 : f32
    %42 = vector.broadcast %cst_22 : f32 to vector<8x128xf32>
    %43 = arith.maximumf %42, %41 : vector<8x128xf32>
    %44 = vector.broadcast %cst_23 : f32 to vector<8x128xf32>
    %45 = arith.minimumf %44, %43 : vector<8x128xf32>
    %cst_24 = arith.constant -1.000000e+04 : f32
    %46 = vector.broadcast %cst_24 : f32 to vector<8x128xf32>
    %47 = arith.select %33, %45, %46 : vector<8x128xi1>, vector<8x128xf32>
    %48 = arith.select %29, %39, %47 : vector<8x128xi1>, vector<8x128xf32>
    %49 = math.exp %48 : vector<8x128xf32>
    %cst_25 = arith.constant 0.000000e+00 : f32
    %50 = vector.broadcast %cst_25 : f32 to vector<8x128xf32>
    %51 = arith.select %29, %49, %50 : vector<8x128xi1>, vector<8x128xf32>
    %cst_26 = arith.constant dense<0.000000e+00> : vector<8xf32>
    %52 = vector.multi_reduction <add>, %51, %cst_26 [1] : vector<8x128xf32> to vector<8xf32>
    %53 = vector.shape_cast %52 : vector<8xf32> to vector<8x1xf32>
    %54 = vector.broadcast %53 : vector<8x1xf32> to vector<8x128xf32>
    %55 = arith.divf %51, %54 : vector<8x128xf32>
    %cst_27 = arith.constant 1.000000e+00 : f32
    %56 = vector.broadcast %cst_27 : f32 to vector<8x128xf32>
    %57 = arith.addf %56, %49 : vector<8x128xf32>
    %cst_28 = arith.constant 1.000000e+00 : f32
    %58 = vector.broadcast %cst_28 : f32 to vector<8x128xf32>
    %59 = arith.divf %58, %57 : vector<8x128xf32>
    %cst_29 = arith.constant 0.000000e+00 : f32
    %60 = vector.broadcast %cst_29 : f32 to vector<8x128xf32>
    %61 = arith.select %33, %59, %60 : vector<8x128xi1>, vector<8x128xf32>
    %62 = arith.select %31, %26, %61 : vector<8x128xi1>, vector<8x128xf32>
    %63 = arith.select %29, %55, %62 : vector<8x128xi1>, vector<8x128xf32>
    %c0_30 = arith.constant 0 : index
    %c0_31 = arith.constant 0 : index
    %64 = vector.load %arg5[%c0_30, %c0_31] : memref<8x128xf32, #tpu.memory_space<vmem>>, vector<8x128xf32>
    tpu.vector_store %arg5[%c0_30, %c0_31], %63 {strides = array<i32>} : memref<8x128xf32, #tpu.memory_space<vmem>>, vector<8x128xf32>,
    return
  }
  func.func @transform_0(%arg0: i32) -> (i32, i32) {
    %c0_i32 = arith.constant 0 : i32
    %c0_i32_0 = arith.constant 0 : i32
    return %arg0, %c0_i32 : i32, i32
  }
  func.func @transform_1(%arg0: i32) -> (i32, i32) {
    %c0_i32 = arith.constant 0 : i32
    %c0_i32_0 = arith.constant 0 : i32
    %c0_i32_1 = arith.constant 0 : i32
    return %c0_i32, %c0_i32_0 : i32, i32
  }
  func.func @transform_2(%arg0: i32) -> (i32, i32) {
    %c0_i32 = arith.constant 0 : i32
    %c0_i32_0 = arith.constant 0 : i32
    %c0_i32_1 = arith.constant 0 : i32
    return %c0_i32, %c0_i32_0 : i32, i32
  }
  func.func @transform_3(%arg0: i32) -> (i32, i32) {
    %c0_i32 = arith.constant 0 : i32
    %c0_i32_0 = arith.constant 0 : i32
    %c0_i32_1 = arith.constant 0 : i32
    return %c0_i32, %c0_i32_0 : i32, i32
  }
  func.func @transform_4(%arg0: i32) -> (i32, i32) {
    %c0_i32 = arith.constant 0 : i32
    %c0_i32_0 = arith.constant 0 : i32
    return %arg0, %c0_i32 : i32, i32
  }
}

</mosaic_0001>

<bundles_post_ra>
// kernel: multi_objective_forward.1
= control target key start
LH: loop header
LB: loop body
LE: loop exit
PB: predicated region body
PF: predicated region fallthrough
CT: control target
= control target key end

     0   :  { %9 = vsyncpa [#allocation3], 0  ;;  %s1107_s0 = inlined_call_operand.hbm [shape: f32[8,16], index: 0, kind: input, shape index: {}]   ;;  %s1108_s1 = inlined_call_operand.hbm [shape: f32[528,128], index: 1, kind: input, shape index: {}]   ;;  %s1109_s2 = inlined_call_operand.hbm [shape: f32[128,384], index: 2, kind: input, shape index: {}]   ;;  %s1110_s3 = inlined_call_operand.hbm [shape: f32[1,768], index: 3, kind: input, shape index: {}]   ;;  %s1111_s4 = inlined_call_operand.vmem [shape: f32[8,128], index: 4, kind: output, shape index: {}]  }
   0x1   :  { %10 = vsyncpa [#allocation5], 0 }
   0x2   :  { %11 = vsyncpa [#allocation8], 0  ;;  %s994_s15 = smov [#allocation4]  }
   0x3   :  { %s27_s16 = sshll.u32 %s994_s15, 4  ;;  %s28_s16 = int_to_ptr.vmem [resolvable:$true] %s27_s16 }
   0x4   :  { %s916_s17 = scalar_lea.vmem %s28_s16, 8448  ;;  %p921_p1 = scmp.lt.s32.totalorder %s28_s16, %s28_s16 }
   0x5   :  { %p917_p0 = scmp.ne.s32.totalorder %s28_s16, %s916_s17  ;;  %p922_p2 = scmp.lt.s32.totalorder %s916_s17, %s916_s17 }
   0x7   :  { %p923_p3 = por %p922_p2, %p921_p1 }
   0x9   :  { %p924_p4 = pnand %p923_p3, %p917_p0 }
   0xb   :  { %927 = shalt.err (!%p924_p4)
}
   0xc   :  { %s995_s18 = smov 128   ;;  %s996_s19 = smov 8  }
   0xd   :  { %33 = dma.hbm_to_vmem [thread:$0]  %s1108_s1, 8448, %s28_s16, [#allocation5], %s995_s18, %s995_s18, %s996_s19  }
   0xe   :  { %s997_s22 = smov [#allocation2]   ;;  %s998_s24 = smov [#allocation6]  }
   0xf   :  { %s18_s23 = sshll.u32 %s997_s22, 4  ;;  %s39_s25 = sshll.u32 %s998_s24, 4  ;;  %s19_s23 = int_to_ptr.vmem [resolvable:$true] %s18_s23  ;;  %s40_s25 = int_to_ptr.vmem [resolvable:$true] %s39_s25 }
  0x10   :  { %s936_s26 = scalar_lea.vmem %s19_s23, 128  ;;  %p941_p6 = scmp.lt.s32.totalorder %s19_s23, %s19_s23 }
  0x11   :  { %p937_p5 = scmp.ne.s32.totalorder %s19_s23, %s936_s26  ;;  %p942_p7 = scmp.lt.s32.totalorder %s936_s26, %s936_s26 }
  0x13   :  { %p943_p8 = por %p942_p7, %p941_p6 }
  0x15   :  { %p944_p9 = pnand %p943_p8, %p937_p5 }
  0x17   :  { %947 = shalt.err (!%p944_p9)
}
  0x18   :  { %21 = dma.hbm_to_vmem [thread:$0]  %s1107_s0, 128, %s19_s23, [#allocation3]  }
  0x19   :  { %s956_s29 = scalar_lea.vmem %s40_s25, 6144  ;;  %p961_p11 = scmp.lt.s32.totalorder %s40_s25, %s40_s25 }
  0x1a   :  { %p957_p10 = scmp.ne.s32.totalorder %s40_s25, %s956_s29  ;;  %p962_p12 = scmp.lt.s32.totalorder %s956_s29, %s956_s29 }
  0x1c   :  { %p963_p13 = por %p962_p12, %p961_p11 }
  0x1e   :  { %p964_p0 = pnand %p963_p13, %p957_p10 }
  0x20   :  { %967 = shalt.err (!%p964_p0)
}
  0x21   :  { %s999_s1 = smov 384   ;;  %s1000_s30 = smov 24  }
  0x22   :  { %45 = dma.hbm_to_vmem [thread:$0]  %s1109_s2, 6144, %s40_s25, [#allocation5], %s999_s1, %s999_s1, %s1000_s30  }
  0x23   :  { %s1001_s7 = smov [#allocation7]  }
  0x24   :  { %s52_s8 = sshll.u32 %s1001_s7, 4  ;;  %s53_s8 = int_to_ptr.vmem [resolvable:$true] %s52_s8 }
  0x25   :  { %s976_s9 = scalar_lea.vmem %s53_s8, 96  ;;  %p981_p2 = scmp.lt.s32.totalorder %s53_s8, %s53_s8 }
  0x26   :  { %p977_p1 = scmp.ne.s32.totalorder %s53_s8, %s976_s9  ;;  %p982_p3 = scmp.lt.s32.totalorder %s976_s9, %s976_s9 }
  0x28   :  { %p983_p4 = por %p982_p3, %p981_p2 }
  0x2a   :  { %p984_p5 = pnand %p983_p4, %p977_p1 }
  0x2c   :  { %987 = shalt.err (!%p984_p5)
}
  0x2d   :  { %55 = dma.hbm_to_vmem [thread:$0]  %s1110_s3, 96, %s53_s8, [#allocation8]  }
  0x2e   :  { %988 = dma.done.wait [#allocation3], 128  }
  0x2f   :  { %989 = vsyncadd [#allocation3], 4294967168 }
  0x30   :  { %990 = dma.done.wait [#allocation5], 14592  }
  0x31   :  { %991 = vsyncadd [#allocation5], 4294952704 }
  0x32   :  { %992 = dma.done.wait [#allocation8], 96  }
  0x33   :  { %993 = vsyncadd [#allocation8], 4294967200  ;;  %v1002_v0 = vmov 0.0   ;;  %vm1003_vm0 = vmmov 0   ;;  %v69_v1 = vld [vmem:[#allocation4 + $0x8] sm:$0xff]  ;;  %v68_v2 = vld [vmem:[#allocation4] sm:$0xff] }
  0x34   :  { %780 = vmatprep.subr.mxu0 %v1002_v0  ;;  %784 = vmatprep.mubr.msk.f32.mxu0 %vm1003_vm0, %v1002_v0  ;;  %v186_v3 = vld [vmem:[#allocation2] sm:$0xff]  ;;  %vm193_vm1 = vcmask 130048   ;;  %v85_v4 = vld [vmem:[#allocation4 + $0x88] sm:$0xff]  ;;  %v84_v5 = vld [vmem:[#allocation4 + $0x80] sm:$0xff] }
  0x35   :  { %787 = vmatprep.subr.mxu1 %v1002_v0  ;;  %819 = vmatprep.mubr.msk.f32.mxu1 %vm1003_vm0, %v1002_v0  ;;  %v83_v6 = vld [vmem:[#allocation4 + $0x78] sm:$0xff]  ;;  %v82_v7 = vld [vmem:[#allocation4 + $0x70] sm:$0xff]  ;;  %v81_v8 = vld [vmem:[#allocation4 + $0x68] sm:$0xff] }
  0x36   :  { %781 = vmatpush3.msra.mxu0 %v69_v1  ;;  %788 = vmatpush3.msra.mxu1 %v85_v4  ;;  %v80_v9 = vld [vmem:[#allocation4 + $0x60] sm:$0xff]  ;;  %v79_v10 = vld [vmem:[#allocation4 + $0x58] sm:$0xff]  ;;  %v78_v11 = vld [vmem:[#allocation4 + $0x50] sm:$0xff] }
  0x37   :  { %782 = vmatprep.subr.mxu0 %v1002_v0  ;;  %789 = vmatprep.subr.mxu1 %v1002_v0  ;;  %v77_v12 = vld [vmem:[#allocation4 + $0x48] sm:$0xff]  ;;  %v76_v13 = vld [vmem:[#allocation4 + $0x40] sm:$0xff]  ;;  %v75_v14 = vld [vmem:[#allocation4 + $0x38] sm:$0xff] }
  0x38   :  { %783 = vmatpush3.msra.mxu0 %v68_v2  ;;  %790 = vmatpush3.msra.mxu1 %v84_v5  ;;  %v74_v15 = vld [vmem:[#allocation4 + $0x30] sm:$0xff]  ;;  %v73_v16 = vld [vmem:[#allocation4 + $0x28] sm:$0xff]  ;;  %v72_v17 = vld [vmem:[#allocation4 + $0x20] sm:$0xff] }
  0x39   :  { %785 = vmatmul.mubr.msk.f32.vlgmr.msra.gmra.mxu0 %vm193_vm1, %v186_v3  ;;  %791 = vmatprep.subr.mxu1 %v1002_v0  ;;  %v71_v18 = vld [vmem:[#allocation4 + $0x18] sm:$0xff]  ;;  %v70_v19 = vld [vmem:[#allocation4 + $0x10] sm:$0xff]  ;;  %v180_v20 = vld [vmem:[#allocation6 + $0x170] sm:$0xff] }
  0x3a   :  { %425 = vmatprep.mubr.f32.mxu0 %v1002_v0  ;;  %792 = vmatpush3.msra.mxu1 %v83_v6  ;;  %v179_v21 = vld [vmem:[#allocation6 + $0x168] sm:$0xff]  ;;  %v177_v22 = vld [vmem:[#allocation6 + $0x158] sm:$0xff]  ;;  %v176_v23 = vld [vmem:[#allocation6 + $0x150] sm:$0xff] }
  0x3b   :  { %793 = vmatprep.subr.mxu1 %v1002_v0  ;;  %361 = vmatprep.subr.mxu0 %v180_v20  ;;  %v174_v24 = vld [vmem:[#allocation6 + $0x140] sm:$0xff]  ;;  %v173_v25 = vld [vmem:[#allocation6 + $0x138] sm:$0xff]  ;;  %v171_v26 = vld [vmem:[#allocation6 + $0x128] sm:$0xff] }
  0x3c   :  { %794 = vmatpush3.msra.mxu1 %v82_v7  ;;  %362 = vmatpush1.msra.mxu0 %v179_v21  ;;  %v170_v27 = vld [vmem:[#allocation6 + $0x120] sm:$0xff]  ;;  %v168_v28 = vld [vmem:[#allocation6 + $0x110] sm:$0xff]  ;;  %v167_v29 = vld [vmem:[#allocation6 + $0x108] sm:$0xff] }
  0x3d   :  { %795 = vmatprep.subr.mxu1 %v1002_v0  ;;  %363 = vmatprep.subr.mxu0 %v177_v22  ;;  %v165_v30 = vld [vmem:[#allocation6 + $0xf8] sm:$0xff]  ;;  %v164_v31 = vld [vmem:[#allocation6 + $0xf0] sm:$0xff]  ;;  %v162_v32 = vld [vmem:[#allocation6 + $0xe0] sm:$0xff] }
  0x3e   :  { %796 = vmatpush3.msra.mxu1 %v81_v8  ;;  %364 = vmatpush1.msra.mxu0 %v176_v23  ;;  %v161_v33 = vld [vmem:[#allocation6 + $0xd8] sm:$0xff]  ;;  %v159_v34 = vld [vmem:[#allocation6 + $0xc8] sm:$0xff]  ;;  %v158_v35 = vld [vmem:[#allocation6 + $0xc0] sm:$0xff] }
  0x3f   :  { %797 = vmatprep.subr.mxu1 %v1002_v0  ;;  %365 = vmatprep.subr.mxu0 %v174_v24  ;;  %v156_v36 = vld [vmem:[#allocation6 + $0xb0] sm:$0xff]  ;;  %v155_v37 = vld [vmem:[#allocation6 + $0xa8] sm:$0xff]  ;;  %v153_v38 = vld [vmem:[#allocation6 + $0x98] sm:$0xff] }
  0x40   :  { %798 = vmatpush3.msra.mxu1 %v80_v9  ;;  %366 = vmatpush1.msra.mxu0 %v173_v25  ;;  %v152_v39 = vld [vmem:[#allocation6 + $0x90] sm:$0xff]  ;;  %v150_v40 = vld [vmem:[#allocation6 + $0x80] sm:$0xff]  ;;  %v149_v41 = vld [vmem:[#allocation6 + $0x78] sm:$0xff] }
  0x41   :  { %799 = vmatprep.subr.mxu1 %v1002_v0  ;;  %367 = vmatprep.subr.mxu0 %v171_v26  ;;  %v147_v42 = vld [vmem:[#allocation6 + $0x68] sm:$0xff]  ;;  %v146_v43 = vld [vmem:[#allocation6 + $0x60] sm:$0xff]  ;;  %v144_v44 = vld [vmem:[#allocation6 + $0x50] sm:$0xff] }
  0x42   :  { %800 = vmatpush3.msra.mxu1 %v79_v10  ;;  %368 = vmatpush1.msra.mxu0 %v170_v27  ;;  %v143_v45 = vld [vmem:[#allocation6 + $0x48] sm:$0xff]  ;;  %v141_v46 = vld [vmem:[#allocation6 + $0x38] sm:$0xff]  ;;  %v686_v47 = vld [vmem:[#allocation7] ss:$0 sm:$0xff] }
  0x43   :  { %801 = vmatprep.subr.mxu1 %v1002_v0  ;;  %369 = vmatprep.subr.mxu0 %v168_v28  ;;  %v181_v52 = vld [vmem:[#allocation6 + $0x178] sm:$0xff]  ;;  %v178_v53 = vld [vmem:[#allocation6 + $0x160] sm:$0xff]  ;;  %v175_v54 = vld [vmem:[#allocation6 + $0x148] sm:$0xff] }
  0x44   :  { %802 = vmatpush3.msra.mxu1 %v78_v11  ;;  %370 = vmatpush1.msra.mxu0 %v167_v29  ;;  %v172_v55 = vld [vmem:[#allocation6 + $0x130] sm:$0xff]  ;;  %v169_v56 = vld [vmem:[#allocation6 + $0x118] sm:$0xff]  ;;  %v166_v57 = vld [vmem:[#allocation6 + $0x100] sm:$0xff] }
  0x45   :  { %803 = vmatprep.subr.mxu1 %v1002_v0  ;;  %371 = vmatprep.subr.mxu0 %v165_v30  ;;  %v163_v58 = vld [vmem:[#allocation6 + $0xe8] sm:$0xff]  ;;  %v160_v59 = vld [vmem:[#allocation6 + $0xd0] sm:$0xff]  ;;  %v157_v60 = vld [vmem:[#allocation6 + $0xb8] sm:$0xff] }
  0x46   :  { %804 = vmatpush3.msra.mxu1 %v77_v12  ;;  %372 = vmatpush1.msra.mxu0 %v164_v31  ;;  %v154_v61 = vld [vmem:[#allocation6 + $0xa0] sm:$0xff]  ;;  %v151_v62 = vld [vmem:[#allocation6 + $0x88] sm:$0xff]  ;;  %v148_v63 = vld [vmem:[#allocation6 + $0x70] sm:$0xff] }
  0x47   :  { %805 = vmatprep.subr.mxu1 %v1002_v0  ;;  %373 = vmatprep.subr.mxu0 %v162_v32  ;;  %v145_v1 = vld [vmem:[#allocation6 + $0x58] sm:$0xff]  ;;  %v140_v2 = vld [vmem:[#allocation6 + $0x30] sm:$0xff]  ;;  %v142_v3 = vld [vmem:[#allocation6 + $0x40] sm:$0xff] }
  0x48   :  { %806 = vmatpush3.msra.mxu1 %v76_v13  ;;  %374 = vmatpush1.msra.mxu0 %v161_v33  ;;  %v138_v4 = vld [vmem:[#allocation6 + $0x20] sm:$0xff]  ;;  %v137_v5 = vld [vmem:[#allocation6 + $0x18] sm:$0xff]  ;;  %v139_v6 = vld [vmem:[#allocation6 + $0x28] sm:$0xff] }
  0x49   :  { %807 = vmatprep.subr.mxu1 %v1002_v0  ;;  %375 = vmatprep.subr.mxu0 %v159_v34  ;;  %v135_v7 = vld [vmem:[#allocation6 + $0x8] sm:$0xff]  ;;  %v134_v8 = vld [vmem:[#allocation6] sm:$0xff]  ;;  %v136_v9 = vld [vmem:[#allocation6 + $0x10] sm:$0xff] }
  0x4a   :  { %808 = vmatpush3.msra.mxu1 %v75_v14  ;;  %376 = vmatpush1.msra.mxu0 %v158_v35  ;;  %v117_v10 = vld [vmem:[#allocation4 + $0x188] sm:$0xff]  ;;  %v688_v11 = vld [vmem:[#allocation7 + $0x1] ss:$0 sm:$0xff]  ;;  %v100_v20 = vld [vmem:[#allocation4 + $0x100] sm:$0xff] }
  0x4b   :  { %809 = vmatprep.subr.mxu1 %v1002_v0  ;;  %377 = vmatprep.subr.mxu0 %v156_v36  ;;  %v115_v21 = vld [vmem:[#allocation4 + $0x178] sm:$0xff]  ;;  %v114_v24 = vld [vmem:[#allocation4 + $0x170] sm:$0xff]  ;;  %v113_v27 = vld [vmem:[#allocation4 + $0x168] sm:$0xff] }
  0x4c   :  { %810 = vmatpush3.msra.mxu1 %v74_v15  ;;  %378 = vmatpush1.msra.mxu0 %v155_v37  ;;  %v131_v22 = vld [vmem:[#allocation4 + $0x1f8] sm:$0xff]  ;;  %v130_v25 = vld [vmem:[#allocation4 + $0x1f0] sm:$0xff]  ;;  %v129_v28 = vld [vmem:[#allocation4 + $0x1e8] sm:$0xff] }
  0x4d   :  { %811 = vmatprep.subr.mxu1 %v1002_v0  ;;  %379 = vmatprep.subr.mxu0 %v153_v38  ;;  %v99_v23 = vld [vmem:[#allocation4 + $0xf8] sm:$0xff]  ;;  %v98_v26 = vld [vmem:[#allocation4 + $0xf0] sm:$0xff]  ;;  %v97_v29 = vld [vmem:[#allocation4 + $0xe8] sm:$0xff] }
  0x4e   :  { %812 = vmatpush3.msra.mxu1 %v73_v16  ;;  %380 = vmatpush1.msra.mxu0 %v152_v39  ;;  %v133_v16 = vld [vmem:[#allocation4 + $0x208] sm:$0xff]  ;;  %v112_v30 = vld [vmem:[#allocation4 + $0x160] sm:$0xff]  ;;  %v111_v33 = vld [vmem:[#allocation4 + $0x158] sm:$0xff] }
  0x4f   :  { %813 = vmatprep.subr.mxu1 %v1002_v0  ;;  %381 = vmatprep.subr.mxu0 %v150_v40  ;;  %v128_v31 = vld [vmem:[#allocation4 + $0x1e0] sm:$0xff]  ;;  %v127_v34 = vld [vmem:[#allocation4 + $0x1d8] sm:$0xff]  ;;  %v110_v36 = vld [vmem:[#allocation4 + $0x150] sm:$0xff] }
  0x50   :  { %814 = vmatpush3.msra.mxu1 %v72_v17  ;;  %382 = vmatpush1.msra.mxu0 %v149_v41  ;;  %v101_v17 = vld [vmem:[#allocation4 + $0x108] sm:$0xff]  ;;  %v96_v32 = vld [vmem:[#allocation4 + $0xe0] sm:$0xff]  ;;  %v95_v35 = vld [vmem:[#allocation4 + $0xd8] sm:$0xff] }
  0x51   :  { %815 = vmatprep.subr.mxu1 %v1002_v0  ;;  %383 = vmatprep.subr.mxu0 %v147_v42  ;;  %v126_v37 = vld [vmem:[#allocation4 + $0x1d0] sm:$0xff]  ;;  %v109_v39 = vld [vmem:[#allocation4 + $0x148] sm:$0xff]  ;;  %v108_v42 = vld [vmem:[#allocation4 + $0x140] sm:$0xff] }
  0x52   :  { %816 = vmatpush3.msra.mxu1 %v71_v18  ;;  %384 = vmatpush1.msra.mxu0 %v146_v43  ;;  %v116_v18 = vld [vmem:[#allocation4 + $0x180] sm:$0xff]  ;;  %v94_v38 = vld [vmem:[#allocation4 + $0xd0] sm:$0xff]  ;;  %v125_v40 = vld [vmem:[#allocation4 + $0x1c8] sm:$0xff] }
  0x53   :  { %817 = vmatprep.subr.mxu1 %v1002_v0  ;;  %385 = vmatprep.subr.mxu0 %v144_v44  ;;  %v93_v41 = vld [vmem:[#allocation4 + $0xc8] sm:$0xff]  ;;  %v124_v43 = vld [vmem:[#allocation4 + $0x1c0] sm:$0xff] }
  0x54   :  { %818 = vmatpush3.msra.mxu1 %v70_v19  ;;  %386 = vmatpush1.msra.mxu0 %v143_v45  ;;  %v132_v19 = vld [vmem:[#allocation4 + $0x200] sm:$0xff]  ;;  %v107_v45 = vld [vmem:[#allocation4 + $0x138] sm:$0xff] }
  0x55   :  { %822 = vmatprep.subr.mxu1 %v1002_v0  ;;  %387 = vmatprep.subr.mxu0 %v141_v46  ;;  %v92_v44 = vld [vmem:[#allocation4 + $0xc0] sm:$0xff]  ;;  %v123_v46 = vld [vmem:[#allocation4 + $0x1b8] sm:$0xff] }
  0x56   :  { %388 = vmatpush1.msra.mxu0 %v140_v2 }
  0x57   :  { %389 = vmatprep.subr.mxu0 %v138_v4 }
  0x58   :  { %390 = vmatpush1.msra.mxu0 %v137_v5 }
  0x59   :  { %391 = vmatprep.subr.mxu0 %v135_v7 }
  0x5a   :  { %392 = vmatpush1.msra.mxu0 %v134_v8 }
  0x5b   :  { %728 = vmatprep.subr.mxu0 %v117_v10 }
  0xf9   :  { %v263_v48 = vpop.f32.mrf.mxu0 }
  0xfa   :  { %v264_v49 = vadd.f32 %v686_v47, %v263_v48  ;;  %v91_v47 = vld [vmem:[#allocation4 + $0xb8] sm:$0xff]  ;;  %v106_v48 = vld [vmem:[#allocation4 + $0x130] sm:$0xff] }
  0xfb   :  { %v786_v50 = vpop.f32.mrf.mxu0 }
  0xfc   :  { %v267_v51 = vmax.f32 %v264_v49, 0.0  ;;  %v122_v49 = vld [vmem:[#allocation4 + $0x1b0] sm:$0xff] }
  0xfd   :  { %v90_v50 = vld [vmem:[#allocation4 + $0xb0] sm:$0xff] }
  0xfe   :  { %820 = vmatmul.mubr.f32.vlgmr.msra.gmra.mxu1 %v267_v51  ;;  %v121_v51 = vld [vmem:[#allocation4 + $0x1a8] sm:$0xff] }
  0xff   :  { %823 = vmatpush3.msra.mxu1 %v181_v52  ;;  %854 = vmatprep.mubr.msk.f32.mxu1 %vm1003_vm0, %v1002_v0  ;;  %v105_v52 = vld [vmem:[#allocation4 + $0x128] sm:$0xff] }
 0x100   :  { %824 = vmatprep.subr.mxu1 %v1002_v0 }
 0x101   :  { %825 = vmatpush3.msra.mxu1 %v178_v53  ;;  %v120_v53 = vld [vmem:[#allocation4 + $0x1a0] sm:$0xff] }
 0x102   :  { %826 = vmatprep.subr.mxu1 %v1002_v0 }
 0x103   :  { %827 = vmatpush3.msra.mxu1 %v175_v54  ;;  %v89_v54 = vld [vmem:[#allocation4 + $0xa8] sm:$0xff] }
 0x104   :  { %828 = vmatprep.subr.mxu1 %v1002_v0 }
 0x105   :  { %829 = vmatpush3.msra.mxu1 %v172_v55  ;;  %v104_v55 = vld [vmem:[#allocation4 + $0x120] sm:$0xff] }
 0x106   :  { %830 = vmatprep.subr.mxu1 %v1002_v0 }
 0x107   :  { %831 = vmatpush3.msra.mxu1 %v169_v56  ;;  %v119_v56 = vld [vmem:[#allocation4 + $0x198] sm:$0xff] }
 0x108   :  { %832 = vmatprep.subr.mxu1 %v1002_v0 }
 0x109   :  { %833 = vmatpush3.msra.mxu1 %v166_v57  ;;  %v88_v57 = vld [vmem:[#allocation4 + $0xa0] sm:$0xff] }
 0x10a   :  { %834 = vmatprep.subr.mxu1 %v1002_v0 }
 0x10b   :  { %835 = vmatpush3.msra.mxu1 %v163_v58  ;;  %v103_v58 = vld [vmem:[#allocation4 + $0x118] sm:$0xff] }
 0x10c   :  { %836 = vmatprep.subr.mxu1 %v1002_v0 }
 0x10d   :  { %837 = vmatpush3.msra.mxu1 %v160_v59  ;;  %v118_v59 = vld [vmem:[#allocation4 + $0x190] sm:$0xff] }
 0x10e   :  { %838 = vmatprep.subr.mxu1 %v1002_v0 }
 0x10f   :  { %839 = vmatpush3.msra.mxu1 %v157_v60  ;;  %v87_v60 = vld [vmem:[#allocation4 + $0x98] sm:$0xff] }
 0x110   :  { %840 = vmatprep.subr.mxu1 %v1002_v0 }
 0x111   :  { %841 = vmatpush3.msra.mxu1 %v154_v61  ;;  %v102_v61 = vld [vmem:[#allocation4 + $0x110] sm:$0xff] }
 0x112   :  { %842 = vmatprep.subr.mxu1 %v1002_v0 }
 0x113   :  { %843 = vmatpush3.msra.mxu1 %v151_v62  ;;  %v86_v62 = vld [vmem:[#allocation4 + $0x90] sm:$0xff] }
 0x114   :  { %844 = vmatprep.subr.mxu1 %v1002_v0 }
 0x115   :  { %845 = vmatpush3.msra.mxu1 %v148_v63  ;;  %v346_v63 = vlaneseq }
 0x116   :  { %846 = vmatprep.subr.mxu1 %v1002_v0 }
 0x117   :  { %847 = vmatpush3.msra.mxu1 %v145_v1  ;;  %v347_v1 = vshrl.u32 %v346_v63, 7 }
 0x118   :  { %848 = vmatprep.subr.mxu1 %v1002_v0 }
 0x119   :  { %849 = vmatpush3.msra.mxu1 %v142_v3  ;;  %v356_v2 = vsub.s32 2, %v347_v1  ;;  %v184_v3 = vld [vmem:[#allocation7 + $0x2] sm:$0x7]  ;;  %v348_v4 = vsub.s32 0, %v347_v1  ;;  %v352_v5 = vsub.s32 1, %v347_v1 }
 0x11a   :  { %850 = vmatprep.subr.mxu1 %v1002_v0 }
 0x11b   :  { %851 = vmatpush3.msra.mxu1 %v139_v6  ;;  %v357_v6 = vrot.slane %v184_v3, %v356_v2  ;;  %v349_v7 = vrot.slane %v184_v3, %v348_v4  ;;  %v353_v8 = vrot.slane %v184_v3, %v352_v5 }
 0x11c   :  { %852 = vmatprep.subr.mxu1 %v1002_v0 }
 0x11d   :  { %853 = vmatpush3.msra.mxu1 %v136_v9 }
 0x11e   :  { %857 = vmatprep.subr.mxu1 %v1002_v0 }
 0x1be   :  { %v340_v12 = vpop.f32.mrf.mxu1 }
 0x1bf   :  { %v341_v13 = vadd.f32 %v688_v11, %v340_v12 }
 0x1c0   :  { %v821_v14 = vpop.f32.mrf.mxu1 }
 0x1c1   :  { %v344_v15 = vmax.f32 %v341_v13, 0.0 }
 0x1c3   :  { %426 = vmatmul.mubr.f32.vlgmr.msra.gmra.mxu0 %v344_v15  ;;  %855 = vmatmul.mubr.f32.vlgmr.msra.gmra.mxu1 %v344_v15 }
 0x1c4   :  { %858 = vmatpush3.msra.mxu1 %v133_v16  ;;  %729 = vmatpush3.msra.mxu0 %v101_v17 }
 0x1c5   :  { %859 = vmatprep.subr.mxu1 %v1002_v0  ;;  %730 = vmatprep.subr.mxu0 %v116_v18 }
 0x1c6   :  { %860 = vmatpush3.msra.mxu1 %v132_v19  ;;  %731 = vmatpush3.msra.mxu0 %v100_v20 }
 0x1c7   :  { %861 = vmatprep.subr.mxu1 %v1002_v0  ;;  %732 = vmatprep.subr.mxu0 %v115_v21  ;;  %v689_v21 = vld [vmem:[#allocation7 + $0x5] ss:$0 sm:$0xff] }
 0x1c8   :  { %862 = vmatpush3.msra.mxu1 %v131_v22  ;;  %733 = vmatpush3.msra.mxu0 %v99_v23  ;;  %v652_v23 = vand.u32 127, %v346_v63 }
 0x1c9   :  { %863 = vmatprep.subr.mxu1 %v1002_v0  ;;  %734 = vmatprep.subr.mxu0 %v114_v24 }
 0x1ca   :  { %864 = vmatpush3.msra.mxu1 %v130_v25  ;;  %735 = vmatpush3.msra.mxu0 %v98_v26  ;;  %vm653_vm2 = vcmp.lt.s32.totalorder %v652_v23, 8  ;;  %vm655_vm3 = vcmp.eq.s32.totalorder %v652_v23, 9  ;;  %vm654_vm4 = vcmp.eq.s32.totalorder %v652_v23, 8 }
 0x1cb   :  { %865 = vmatprep.subr.mxu1 %v1002_v0  ;;  %736 = vmatprep.subr.mxu0 %v113_v27 }
 0x1cc   :  { %866 = vmatpush3.msra.mxu1 %v129_v28  ;;  %737 = vmatpush3.msra.mxu0 %v97_v29 }
 0x1cd   :  { %867 = vmatprep.subr.mxu1 %v1002_v0  ;;  %738 = vmatprep.subr.mxu0 %v112_v30 }
 0x1ce   :  { %868 = vmatpush3.msra.mxu1 %v128_v31  ;;  %739 = vmatpush3.msra.mxu0 %v96_v32 }
 0x1cf   :  { %869 = vmatprep.subr.mxu1 %v1002_v0  ;;  %740 = vmatprep.subr.mxu0 %v111_v33 }
 0x1d0   :  { %870 = vmatpush3.msra.mxu1 %v127_v34  ;;  %741 = vmatpush3.msra.mxu0 %v95_v35 }
 0x1d1   :  { %871 = vmatprep.subr.mxu1 %v1002_v0  ;;  %742 = vmatprep.subr.mxu0 %v110_v36 }
 0x1d2   :  { %872 = vmatpush3.msra.mxu1 %v126_v37  ;;  %743 = vmatpush3.msra.mxu0 %v94_v38 }
 0x1d3   :  { %873 = vmatprep.subr.mxu1 %v1002_v0  ;;  %744 = vmatprep.subr.mxu0 %v109_v39 }
 0x1d4   :  { %874 = vmatpush3.msra.mxu1 %v125_v40  ;;  %745 = vmatpush3.msra.mxu0 %v93_v41 }
 0x1d5   :  { %875 = vmatprep.subr.mxu1 %v1002_v0  ;;  %746 = vmatprep.subr.mxu0 %v108_v42 }
 0x1d6   :  { %876 = vmatpush3.msra.mxu1 %v124_v43  ;;  %747 = vmatpush3.msra.mxu0 %v92_v44 }
 0x1d7   :  { %877 = vmatprep.subr.mxu1 %v1002_v0  ;;  %748 = vmatprep.subr.mxu0 %v107_v45 }
 0x1d8   :  { %878 = vmatpush3.msra.mxu1 %v123_v46  ;;  %749 = vmatpush3.msra.mxu0 %v91_v47 }
 0x1d9   :  { %879 = vmatprep.subr.mxu1 %v1002_v0  ;;  %750 = vmatprep.subr.mxu0 %v106_v48 }
 0x1da   :  { %880 = vmatpush3.msra.mxu1 %v122_v49  ;;  %751 = vmatpush3.msra.mxu0 %v90_v50 }
 0x1db   :  { %881 = vmatprep.subr.mxu1 %v1002_v0  ;;  %889 = vmatprep.mubr.msk.f32.mxu1 %vm1003_vm0, %v1002_v0 }
 0x1dc   :  { %882 = vmatpush3.msra.mxu1 %v121_v51  ;;  %752 = vmatprep.subr.mxu0 %v105_v52 }
 0x1dd   :  { %883 = vmatprep.subr.mxu1 %v1002_v0  ;;  %753 = vmatpush3.msra.mxu0 %v89_v54 }
 0x1de   :  { %884 = vmatpush3.msra.mxu1 %v120_v53  ;;  %754 = vmatprep.subr.mxu0 %v104_v55 }
 0x1df   :  { %885 = vmatprep.subr.mxu1 %v1002_v0  ;;  %755 = vmatpush3.msra.mxu0 %v88_v57 }
 0x1e0   :  { %886 = vmatpush3.msra.mxu1 %v119_v56  ;;  %756 = vmatprep.subr.mxu0 %v103_v58 }
 0x1e1   :  { %887 = vmatprep.subr.mxu1 %v1002_v0  ;;  %757 = vmatpush3.msra.mxu0 %v87_v60 }
 0x1e2   :  { %888 = vmatpush3.msra.mxu1 %v118_v59  ;;  %758 = vmatprep.subr.mxu0 %v102_v61 }
 0x1e3   :  { %759 = vmatpush3.msra.mxu0 %v86_v62 }
 0x283   :  { %v427_v0 = vpop.f32.mrf.mxu0  ;;  %v498_v9 = vpop.f32.mrf.mxu1 }
 0x284   :  { %v499_v10 = vadd.f32 %v498_v9, %v357_v6  ;;  %v428_v11 = vadd.f32 %v427_v0, %v349_v7 }
 0x285   :  { %v429_v12 = vpop.f32.mrf.mxu0  ;;  %v856_v13 = vpop.f32.mrf.mxu1 }
 0x286   :  { %v504_v14 = vmax.f32 %v499_v10, 0.0  ;;  %v430_v15 = vadd.f32 %v429_v12, %v353_v8  ;;  %v502_v17 = vmax.f32 %v428_v11, 0.0 }
 0x288   :  { %v503_v16 = vmax.f32 %v430_v15, 0.0  ;;  %890 = vmatmul.mubr.f32.vlgmr.msra.gmra.mxu1 %v504_v14 }
 0x28a   :  { %575 = vmatprep.mubr.f32.mxu0 %v503_v16 }
 0x28b   :  { %576 = vmatmul.mubr.f32.vlgmr.msra.gmra.mxu0 %v502_v17 }
 0x348   :  { %v647_v18 = vpop.f32.mrf.mxu1 }
 0x34a   :  { %v891_v19 = vpop.f32.mrf.mxu1 }
 0x34b   :  { %v760_v20 = vpop.f32.mrf.mxu0 }
 0x34d   :  { %v761_v22 = vpop.f32.mrf.mxu0 }
 0x34e   :  { %v762_v24 = vadd.f32 %v761_v22, %v760_v20 }
 0x350   :  { %v578_v25 = vadd.f32 %v762_v24, %v689_v21 }
 0x352   :  { %v648_v26 = vadd.f32 %v647_v18, %v578_v25 }
 0x354   :  { %v656_v27 = vsel %vm653_vm2, %v648_v26, -1e+30  ;;  %v660_v28 = vsub.f32 0.0, %v648_v26 }
 0x355   :  { %657 = vmax.xlane.f32.xlu0 %v656_v27 }
 0x356   :  { %v690_v29 = vclamps-f32 %v660_v28, 30.0 }
 0x358   :  { %v663_v32 = vsel %vm655_vm3, %v690_v29, -10000.0 }
 0x3de   :  { %v658_v30 = vpop.xlane.xlu0 %657 }
 0x3df   :  { %v659_v31 = vsub.f32 %v648_v26, %v658_v30 }
 0x3e1   :  { %v664_v33 = vsel %vm653_vm2, %v659_v31, %v663_v32 }
 0x3e2   :  { %v665_v34 = vmul.f32 1.442695, %v664_v33 }
 0x3e4   :  { %902 = vpow2.f32 %v665_v34 }
 0x3f1   :  { %v903_v35 = vpop.eup %902 }
 0x3f2   :  { %v672_v36 = vadd.f32 1.0, %v903_v35  ;;  %v667_v37 = vsel %vm653_vm2, %v903_v35, 0.0 }
 0x3f3   :  { %668 = vadd.xlane.f32.xlu0 %v667_v37 }
 0x3f4   :  { %904 = vrcp.f32 %v672_v36 }
 0x401   :  { %v905_v38 = vpop.eup %904 }
 0x402   :  { %v675_v39 = vsel %vm655_vm3, %v905_v38, 0.0 }
 0x403   :  { %v676_v40 = vsel %vm654_vm4, %v648_v26, %v675_v39 }
 0x47c   :  { %v669_v41 = vpop.xlane.xlu0 %668 }
 0x47d   :  { %906 = vrcp.f32 %v669_v41 }
 0x48a   :  { %v907_v42 = vpop.eup %906 }
 0x48b   :  { %v671_v43 = vmul.f32 %v907_v42, %v667_v37 }
 0x48d   :  { %v677_v44 = vsel %vm653_vm2, %v671_v43, %v676_v40 }
 0x48e   :  { %678 = vst [vmem:[%s1111_s4] sm:$0xff] %v677_v44 }
 0x48f   :  { %683 = vsyncpa [#allocation3], 1 }
 0x490   :  { %684 = vsyncpa [#allocation5], 1 }
 0x491   :  { %685 = vsyncpa [#allocation8], 1 }

</bundles_post_ra>
